<compile_context>
chip_gen: v7x
topology: tpu7x:2x2x1
jax: 0.10.0
libtpu: 0.0.40
codegen_flags: <defaults>
</compile_context>

<pallas_src>
import functools

import jax
import jax.numpy as jnp
from jax.experimental import pallas as pl
from jax.experimental.pallas import tpu as pltpu


LANE = 128            # lane width: last dims padded to a multiple of this
SUBLANE = 8           # f32 sublane granularity for row tiles
MAX_TN = 512          # row-tile cap (512-row tiles ~85% of HBM roofline)
MAX_ROW_PAD = 64      # max tolerated garbage pad rows when picking TN
_MiB = 1024 * 1024
_VMEM_BUDGET = 40 * _MiB     # planning budget: safe on v5e / v6e / v7x
_VMEM_LIMIT_CAP = 48 * _MiB  # never request more scoped VMEM than this


def _round_up(n, m):
    return ((n + m - 1) // m) * m


# ----------------------------------------------------------------------------
# Kernels
# ----------------------------------------------------------------------------
def _mlp_kernel_resident(x_ref, w1_ref, b1_ref, w2_ref, b2_ref, o_ref):
    """One row-tile of the fused MLP; weights/biases stay resident in VMEM."""
    # First linear on the MXU with f32 accumulation, bias + ReLU in f32.
    h = jnp.dot(x_ref[...], w1_ref[...], preferred_element_type=jnp.float32)
    h = jnp.maximum(h + b1_ref[...].astype(jnp.float32), 0.0)      # (TN, Hp)
    # Second linear; cast activations to the weight dtype (no-op for f32,
    # bf16 MXU inputs when compute_dtype=bfloat16).
    y = jnp.dot(h.astype(w2_ref.dtype), w2_ref[...],
                preferred_element_type=jnp.float32)
    o_ref[...] = (y + b2_ref[...].astype(jnp.float32)).astype(o_ref.dtype)


def _mlp_kernel_stream_h(x_ref, w1_ref, b1_ref, w2_ref, b2_ref, o_ref,
                         acc_ref):
    """Row tile x hidden tile; weights streamed, f32 accumulator in VMEM.

    ReLU per hidden tile is exact: every hidden unit's pre-activation is
    fully contracted over D_in inside its own tile.
    """
    h_idx = pl.program_id(1)

    @pl.when(h_idx == 0)
    def _():
        acc_ref[...] = jnp.zeros_like(acc_ref)

    h = jnp.dot(x_ref[...], w1_ref[...], preferred_element_type=jnp.float32)
    h = jnp.maximum(h + b1_ref[...].astype(jnp.float32), 0.0)      # (TN, TH)
    acc_ref[...] += jnp.dot(h.astype(w2_ref.dtype), w2_ref[...],
                            preferred_element_type=jnp.float32)

    @pl.when(h_idx == pl.num_programs(1) - 1)
    def _():
        o_ref[...] = (acc_ref[...]
                      + b2_ref[...].astype(jnp.float32)).astype(o_ref.dtype)


# ----------------------------------------------------------------------------
# Param preparation (one-time, outside the hot path)
# ----------------------------------------------------------------------------
def prepare_params(w1, b1, w2, b2, compute_dtype=jnp.bfloat16):
    """Convert torch.nn.Linear layout to kernel layout (pad + transpose).

    w1: (H, D_in), b1: (H,), w2: (D_out, H), b2: (D_out,)
    Returns lane-padded, pre-transposed params:
      w1_t: (D_in_p, H_p), b1: (1, H_p), w2_t: (H_p, D_out_p), b2: (1, D_out_p)
    Zero padding keeps the math exact: padded hidden columns get bias 0 and
    ReLU(0)=0, and padded rows/cols of W2/b2 only feed the (sliced-off)
    output pad columns.  Biases stay f32 (bias/ReLU math is always f32).
    """
    H, D_in = w1.shape
    D_out = w2.shape[0]
    D_in_p = _round_up(D_in, LANE)
    H_p = _round_up(H, LANE)
    D_out_p = _round_up(D_out, LANE)

    w1_t = jnp.zeros((D_in_p, H_p), compute_dtype).at[:D_in, :H].set(
        jnp.transpose(w1).astype(compute_dtype))
    w2_t = jnp.zeros((H_p, D_out_p), compute_dtype).at[:H, :D_out].set(
        jnp.transpose(w2).astype(compute_dtype))
    b1_p = jnp.zeros((1, H_p), jnp.float32).at[0, :H].set(
        b1.astype(jnp.float32))
    b2_p = jnp.zeros((1, D_out_p), jnp.float32).at[0, :D_out].set(
        b2.astype(jnp.float32))
    return w1_t, b1_p, w2_t, b2_p, (D_in, H, D_out)


# ----------------------------------------------------------------------------
# Tiling / VMEM planning
# ----------------------------------------------------------------------------
def _resident_spec(block_shape, index_map):
    """BlockSpec for a block identical across all grid steps (fetched once).

    Single-buffered so it doesn't pay for a useless second pipeline buffer.
    """
    try:
        return pl.BlockSpec(block_shape, index_map,
                            pipeline_mode=pl.Buffered(1))
    except (TypeError, ValueError, AttributeError):
        # Older JAX without pipeline_mode / Buffered: default double buffer.
        return pl.BlockSpec(block_shape, index_map)


def _choose_row_tile(n_rows, per_row_bytes, avail_bytes, max_tn=MAX_TN):
    """Largest row tile that fits `avail_bytes` with bounded padding waste."""
    n_p8 = _round_up(max(n_rows, 1), SUBLANE)
    cap = (avail_bytes // max(per_row_bytes, 1)) // SUBLANE * SUBLANE
    cap = max(SUBLANE, min(cap, max_tn, n_p8))
    if n_p8 <= cap:
        tn = n_p8
    else:
        tn = SUBLANE                      # always valid: n_p8 % 8 == 0
        for cand in range(cap, SUBLANE - 1, -SUBLANE):
            if (-n_p8) % cand <= MAX_ROW_PAD:
                tn = cand
                break
    return tn, _round_up(n_p8, tn)


def _maybe_split_rows(tn, n_pad):
    """Ensure >=2 row tiles when possible so v7x's second TC gets work."""
    if n_pad // tn == 1 and n_pad >= 2 * SUBLANE and tn > SUBLANE:
        tn = _round_up((n_pad + 1) // 2, SUBLANE)
        n_pad = _round_up(n_pad, tn)
    return tn, n_pad
    # NOTE: if plain "parallel" does not shard across the two v7x TCs, switch
    # this axis to pltpu.CORE_PARALLEL (each TC keeps its own weight copy).


def _plan_resident(n_rows, d_in_p, h_p, d_out_p, in_bytes, out_bytes, budget):
    """Plan for the weights-resident kernel; None if weights don't fit."""
    weight_bytes = ((d_in_p * h_p + h_p * d_out_p) * in_bytes
                    + (h_p + d_out_p) * 4)                 # single-buffered
    # 2x-buffered x/out tiles + f32 hidden intermediate (Mosaic scratch).
    per_row = 2 * d_in_p * in_bytes + 2 * d_out_p * out_bytes + h_p * 4
    avail = budget - weight_bytes
    if avail < SUBLANE * per_row:
        return None                       # fall back to the streamed kernel
    tn, n_pad = _choose_row_tile(n_rows, per_row, avail)
    tn, n_pad = _maybe_split_rows(tn, n_pad)
    return tn, n_pad, weight_bytes + tn * per_row


def _plan_stream(n_rows, d_in_p, h_p, d_out_p, in_bytes, out_bytes, budget,
                 h_tile=None):
    """Plan for the streamed-H fallback kernel."""
    per_row = 2 * d_in_p * in_bytes + 2 * d_out_p * out_bytes + d_out_p * 4
    tn, n_pad = _choose_row_tile(n_rows, per_row + LANE * 4, budget // 2,
                                 max_tn=256)
    tn, n_pad = _maybe_split_rows(tn, n_pad)

    def tile_bytes(th):
        return (tn * per_row + 2 * d_out_p * 4
                + 2 * th * (d_in_p * in_bytes + 4 + d_out_p * in_bytes)
                + tn * th * 4)

    if h_tile is not None:
        th = h_tile
    else:
        th = LANE                          # LANE always divides h_p
        for cand in range(h_p, LANE - 1, -LANE):
            if h_p % cand == 0 and tile_bytes(cand) <= budget:
                th = cand
                break
    return tn, n_pad, th, tile_bytes(th)


# ----------------------------------------------------------------------------
# Forward pass
# ----------------------------------------------------------------------------
@functools.partial(jax.jit, static_argnames=("dims", "out_dtype",
                                             "force_stream_h", "h_tile"))
def two_layer_net(x, w1_t, b1_p, w2_t, b2_p, dims,
                  out_dtype=jnp.float32, force_stream_h=False, h_tile=None):
    """Forward pass of Net on prepared (padded / transposed) params.

    x: (N, D_in) float.  Returns (N, D_out) in out_dtype.
    """
    D_in, _, D_out = dims
    N = x.shape[0]
    D_in_p, H_p = w1_t.shape
    D_out_p = w2_t.shape[1]
    compute_dtype = w1_t.dtype
    in_bytes = jnp.dtype(compute_dtype).itemsize
    out_bytes = jnp.dtype(out_dtype).itemsize

    if h_tile is not None and (h_tile % LANE != 0 or H_p % h_tile != 0):
        raise ValueError("h_tile must be a multiple of 128 dividing padded H")

    want_stream = force_stream_h or (h_tile is not None)
    plan = None if want_stream else _plan_resident(
        N, D_in_p, H_p, D_out_p, in_bytes, out_bytes, _VMEM_BUDGET)
    if plan is not None:
        TN, N_pad, usage = plan
    else:
        TN, N_pad, TH, usage = _plan_stream(
            N, D_in_p, H_p, D_out_p, in_bytes, out_bytes, _VMEM_BUDGET,
            h_tile)
    vmem_limit = int(min(max(usage + 6 * _MiB, 16 * _MiB), _VMEM_LIMIT_CAP))

    # Fast path: skip the extra HBM pass when x is already aligned.
    if N_pad == N and D_in_p == D_in:
        x_p = x.astype(compute_dtype)
    else:
        # Build the padded activation directly in the compute dtype.  Zero
        # pad lanes/rows are exact (never rely on uninitialized pad lanes).
        x_p = jnp.zeros((N_pad, D_in_p), compute_dtype)
        x_p = x_p.at[:N, :D_in].set(x.astype(compute_dtype))

    if plan is not None:
        out_p = pl.pallas_call(
            _mlp_kernel_resident,
            out_shape=jax.ShapeDtypeStruct((N_pad, D_out_p), out_dtype),
            grid=(N_pad // TN,),
            in_specs=[
                # Row-tiled activation input.
                pl.BlockSpec((TN, D_in_p), lambda i: (i, 0)),
                # Weights / biases: constant block -> resident, fetched once.
                _resident_spec((D_in_p, H_p), lambda i: (0, 0)),
                _resident_spec((1, H_p), lambda i: (0, 0)),
                _resident_spec((H_p, D_out_p), lambda i: (0, 0)),
                _resident_spec((1, D_out_p), lambda i: (0, 0)),
            ],
            out_specs=pl.BlockSpec((TN, D_out_p), lambda i: (i, 0)),
            compiler_params=pltpu.CompilerParams(
                dimension_semantics=("parallel",),
                vmem_limit_bytes=vmem_limit),
        )(x_p, w1_t, b1_p, w2_t, b2_p)
    else:
        out_p = pl.pallas_call(
            _mlp_kernel_stream_h,
            out_shape=jax.ShapeDtypeStruct((N_pad, D_out_p), out_dtype),
            grid=(N_pad // TN, H_p // TH),
            in_specs=[
                pl.BlockSpec((TN, D_in_p), lambda i, h: (i, 0)),
                pl.BlockSpec((D_in_p, TH), lambda i, h: (0, h)),
                pl.BlockSpec((1, TH), lambda i, h: (0, h)),
                pl.BlockSpec((TH, D_out_p), lambda i, h: (h, 0)),
                _resident_spec((1, D_out_p), lambda i, h: (0, 0)),
            ],
            out_specs=pl.BlockSpec((TN, D_out_p), lambda i, h: (i, 0)),
            scratch_shapes=[pltpu.VMEM((TN, D_out_p), jnp.float32)],
            compiler_params=pltpu.CompilerParams(
                dimension_semantics=("parallel", "arbitrary"),
                vmem_limit_bytes=vmem_limit),
        )(x_p, w1_t, b1_p, w2_t, b2_p)

    # Fast path: no output slice when already aligned.
    if N_pad == N and D_out_p == D_out:
        return out_p
    return out_p[:N, :D_out]


# ----------------------------------------------------------------------------
# Demo / self-check
# ----------------------------------------------------------------------------
if __name__ == "__main__":
    key = jax.random.PRNGKey(0)

    def torch_like_init(k, shape_w, shape_b, fan_in):
        kw, kb = jax.random.split(k)
        bound = 1.0 / jnp.sqrt(fan_in)
        w = jax.random.uniform(kw, shape_w, jnp.float32, -bound, bound)
        b = jax.random.uniform(kb, shape_b, jnp.float32, -bound, bound)
        return w, b

    # --- Demo 1: small unaligned shapes, f32 compute, strict check ---------
    N, D_in, H, D_out = 8, 64, 32, 16
    k0, k1, k2, key = jax.random.split(key, 4)
    x = jax.random.normal(k0, (N, D_in), jnp.float32)
    w1, b1 = torch_like_init(k1, (H, D_in), (H,), D_in)
    w2, b2 = torch_like_init(k2, (D_out, H), (D_out,), H)

    w1_t, b1_pp, w2_t, b2_pp, dims = prepare_params(
        w1, b1, w2, b2, compute_dtype=jnp.float32)
    y = two_layer_net(x, w1_t, b1_pp, w2_t, b2_pp, dims=dims)
    jax.block_until_ready(y)
    y_ref = jnp.maximum(x @ w1.T + b1, 0.0) @ w2.T + b2
    assert y.shape == (N, D_out)
    assert jnp.allclose(y, y_ref, atol=1e-5, rtol=1e-5)

    # --- Demo 2: aligned fast path, default bf16 compute, 2 row tiles ------
    N2, D_in2, H2, D_out2 = 256, 128, 256, 128
    k0, k1, k2, key = jax.random.split(key, 4)
    x2 = jax.random.normal(k0, (N2, D_in2), jnp.float32)
    w1b, b1b = torch_like_init(k1, (H2, D_in2), (H2,), D_in2)
    w2b, b2b = torch_like_init(k2, (D_out2, H2), (D_out2,), H2)

    pw1, pb1, pw2, pb2, dims2 = prepare_params(w1b, b1b, w2b, b2b)  # bf16
    y2 = two_layer_net(x2, pw1, pb1, pw2, pb2, dims=dims2)
    jax.block_until_ready(y2)
    y2_ref = jnp.maximum(x2 @ w1b.T + b1b, 0.0) @ w2b.T + b2b
    assert y2.shape == (N2, D_out2)
    assert jnp.allclose(y2, y2_ref, atol=6e-2, rtol=6e-2)   # bf16 tolerance

    # --- Demo 3: streamed-H fallback kernel (f32, 2 hidden tiles) ----------
    fw1, fb1, fw2, fb2, dims3 = prepare_params(
        w1b, b1b, w2b, b2b, compute_dtype=jnp.float32)
    y3 = two_layer_net(x2, fw1, fb1, fw2, fb2, dims=dims3, h_tile=128)
    jax.block_until_ready(y3)
    assert jnp.allclose(y3, y2_ref, atol=1e-4, rtol=1e-4)

    print("KERNEL_OK")
</pallas_src>

<mosaic_0001>
module attributes {stable_mosaic.version = 11 : i64} {
  func.func @_mlp_kernel_resident(%arg0: i32, %arg1: memref<8x128xf32, #tpu.memory_space<vmem>>, %arg2: memref<128x128xf32, #tpu.memory_space<vmem>>, %arg3: memref<1x128xf32, #tpu.memory_space<vmem>>, %arg4: memref<128x128xf32, #tpu.memory_space<vmem>>, %arg5: memref<1x128xf32, #tpu.memory_space<vmem>>, %arg6: memref<8x128xf32, #tpu.memory_space<vmem>>) attributes {dimension_semantics = [#tpu.dimension_semantics<parallel>], iteration_bounds = array<i64: 1>, scalar_prefetch = 0 : i64, scratch_operands = 0 : i64, tpu.core_type = #tpu.core_type<tc>, window_params = [{transform_indices = @transform_0, window_bounds = array<i64: 8, 128>}, {pipeline_mode = #tpu.pipeline_mode<synchronous>, transform_indices = @transform_1, window_bounds = array<i64: 128, 128>}, {pipeline_mode = #tpu.pipeline_mode<synchronous>, transform_indices = @transform_2, window_bounds = array<i64: 1, 128>}, {pipeline_mode = #tpu.pipeline_mode<synchronous>, transform_indices = @transform_3, window_bounds = array<i64: 128, 128>}, {pipeline_mode = #tpu.pipeline_mode<synchronous>, transform_indices = @transform_4, window_bounds = array<i64: 1, 128>}, {transform_indices = @transform_5, window_bounds = array<i64: 8, 128>}]} {
    %c0 = arith.constant 0 : index
    %c0_0 = arith.constant 0 : index
    %0 = vector.load %arg1[%c0, %c0_0] : memref<8x128xf32, #tpu.memory_space<vmem>>, vector<8x128xf32>
    %c0_1 = arith.constant 0 : index
    %c0_2 = arith.constant 0 : index
    %1 = vector.load %arg2[%c0_1, %c0_2] : memref<128x128xf32, #tpu.memory_space<vmem>>, vector<128x128xf32>
    %cst = arith.constant dense<0.000000e+00> : vector<8x128xf32>
    %2 = tpu.matmul %0, %1, %cst {dimension_numbers = #tpu.dot_dimension_numbers<[1], [0], [0], [1], [0, 0, 1, 1], [], []>} : vector<8x128xf32>, vector<128x128xf32>, vector<8x128xf32> -> vector<8x128xf32>
    %c0_3 = arith.constant 0 : index
    %c0_4 = arith.constant 0 : index
    %3 = vector.load %arg3[%c0_3, %c0_4] : memref<1x128xf32, #tpu.memory_space<vmem>>, vector<1x128xf32>
    %4 = vector.broadcast %3 : vector<1x128xf32> to vector<8x128xf32>
    %5 = arith.addf %2, %4 : vector<8x128xf32>
    %cst_5 = arith.constant 0.000000e+00 : f32
    %6 = vector.broadcast %cst_5 : f32 to vector<8x128xf32>
    %7 = arith.maximumf %5, %6 : vector<8x128xf32>
    %c0_6 = arith.constant 0 : index
    %c0_7 = arith.constant 0 : index
    %8 = vector.load %arg4[%c0_6, %c0_7] : memref<128x128xf32, #tpu.memory_space<vmem>>, vector<128x128xf32>
    %cst_8 = arith.constant dense<0.000000e+00> : vector<8x128xf32>
    %9 = tpu.matmul %7, %8, %cst_8 {dimension_numbers = #tpu.dot_dimension_numbers<[1], [0], [0], [1], [0, 0, 1, 1], [], []>} : vector<8x128xf32>, vector<128x128xf32>, vector<8x128xf32> -> vector<8x128xf32>
    %c0_9 = arith.constant 0 : index
    %c0_10 = arith.constant 0 : index
    %10 = vector.load %arg5[%c0_9, %c0_10] : memref<1x128xf32, #tpu.memory_space<vmem>>, vector<1x128xf32>
    %11 = vector.broadcast %10 : vector<1x128xf32> to vector<8x128xf32>
    %12 = arith.addf %9, %11 : vector<8x128xf32>
    %c0_11 = arith.constant 0 : index
    %c0_12 = arith.constant 0 : index
    %13 = vector.load %arg6[%c0_11, %c0_12] : memref<8x128xf32, #tpu.memory_space<vmem>>, vector<8x128xf32>
    tpu.vector_store %arg6[%c0_11, %c0_12], %12 {strides = array<i32>} : memref<8x128xf32, #tpu.memory_space<vmem>>, vector<8x128xf32>,
    return
  }
  func.func @transform_0(%arg0: i32) -> (i32, i32) {
    %c0_i32 = arith.constant 0 : i32
    %c0_i32_0 = arith.constant 0 : i32
    return %arg0, %c0_i32 : i32, i32
  }
  func.func @transform_1(%arg0: i32) -> (i32, i32) {
    %c0_i32 = arith.constant 0 : i32
    %c0_i32_0 = arith.constant 0 : i32
    %c0_i32_1 = arith.constant 0 : i32
    return %c0_i32, %c0_i32_0 : i32, i32
  }
  func.func @transform_2(%arg0: i32) -> (i32, i32) {
    %c0_i32 = arith.constant 0 : i32
    %c0_i32_0 = arith.constant 0 : i32
    %c0_i32_1 = arith.constant 0 : i32
    return %c0_i32, %c0_i32_0 : i32, i32
  }
  func.func @transform_3(%arg0: i32) -> (i32, i32) {
    %c0_i32 = arith.constant 0 : i32
    %c0_i32_0 = arith.constant 0 : i32
    %c0_i32_1 = arith.constant 0 : i32
    return %c0_i32, %c0_i32_0 : i32, i32
  }
  func.func @transform_4(%arg0: i32) -> (i32, i32) {
    %c0_i32 = arith.constant 0 : i32
    %c0_i32_0 = arith.constant 0 : i32
    %c0_i32_1 = arith.constant 0 : i32
    return %c0_i32, %c0_i32_0 : i32, i32
  }
  func.func @transform_5(%arg0: i32) -> (i32, i32) {
    %c0_i32 = arith.constant 0 : i32
    %c0_i32_0 = arith.constant 0 : i32
    return %arg0, %c0_i32 : i32, i32
  }
}

</mosaic_0001>

<bundles_post_ra>
// kernel: two_layer_net.1
= control target key start
LH: loop header
LB: loop body
LE: loop exit
PB: predicated region body
PF: predicated region fallthrough
CT: control target
= control target key end

     0   :  { %10 = vsyncpa [#allocation3], 0  ;;  %s587_s0 = inlined_call_operand.vmem [shape: f32[8,128], index: 0, kind: input, shape index: {}]   ;;  %s588_s1 = inlined_call_operand.hbm [shape: f32[128,128], index: 1, kind: input, shape index: {}]   ;;  %s589_s2 = inlined_call_operand.vmem [shape: f32[1,128], index: 2, kind: input, shape index: {}]   ;;  %s590_s3 = inlined_call_operand.hbm [shape: f32[128,128], index: 3, kind: input, shape index: {}]   ;;  %s591_s4 = inlined_call_operand.vmem [shape: f32[1,128], index: 4, kind: input, shape index: {}]   ;;  %s592_s5 = inlined_call_operand.hbm [shape: f32[8,128], index: 5, kind: output, shape index: {}]  }
   0x1   :  { %11 = vsyncpa [#allocation6], 0 }
   0x2   :  { %12 = vsyncpa [#allocation4], 0  ;;  %s488_s18 = smov [#allocation2]   ;;  %s416_s22 = scalar_lea.hbm %s588_s1, 2048 }
   0x3   :  { %s20_s19 = sshll.u32 %s488_s18, 4  ;;  %p417_p0 = scmp.ne.s32.totalorder %s588_s1, %s416_s22  ;;  %s21_s19 = int_to_ptr.vmem [resolvable:$true] %s20_s19 }
   0x4   :  { %p420_p1 = scmp.lt.u32.totalorder %s416_s22, %s588_s1 }
   0x6   :  { %p422_p2 = pnand %p420_p1, %p417_p0 }
   0x8   :  { %425 = shalt.err (!%p422_p2)
}
   0x9   :  { %s426_s27 = scalar_lea.vmem %s21_s19, 2048  ;;  %p431_p4 = scmp.lt.s32.totalorder %s21_s19, %s21_s19 }
   0xa   :  { %p427_p3 = scmp.ne.s32.totalorder %s21_s19, %s426_s27  ;;  %p432_p5 = scmp.lt.s32.totalorder %s426_s27, %s426_s27 }
   0xc   :  { %p433_p6 = por %p432_p5, %p431_p4 }
   0xe   :  { %p434_p7 = pnand %p433_p6, %p427_p3 }
  0x10   :  { %437 = shalt.err (!%p434_p7)
}
  0x11   :  { %s489_s28 = smov 128   ;;  %s490_s29 = smov 8  }
  0x12   :  { %26 = dma.hbm_to_vmem [thread:$0]  %s588_s1, 2048, %s21_s19, [#allocation3], %s489_s28, %s489_s28, %s490_s29  }
  0x13   :  { %s491_s7 = smov [#allocation5]   ;;  %s438_s11 = scalar_lea.hbm %s590_s3, 2048 }
  0x14   :  { %s34_s8 = sshll.u32 %s491_s7, 4  ;;  %p439_p8 = scmp.ne.s32.totalorder %s590_s3, %s438_s11  ;;  %s35_s8 = int_to_ptr.vmem [resolvable:$true] %s34_s8 }
  0x15   :  { %p442_p9 = scmp.lt.u32.totalorder %s438_s11, %s590_s3 }
  0x17   :  { %p444_p10 = pnand %p442_p9, %p439_p8 }
  0x19   :  { %447 = shalt.err (!%p444_p10)
}
  0x1a   :  { %s448_s16 = scalar_lea.vmem %s35_s8, 2048  ;;  %p453_p12 = scmp.lt.s32.totalorder %s35_s8, %s35_s8 }
  0x1b   :  { %p449_p11 = scmp.ne.s32.totalorder %s35_s8, %s448_s16  ;;  %p454_p13 = scmp.lt.s32.totalorder %s448_s16, %s448_s16 }
  0x1d   :  { %p455_p0 = por %p454_p13, %p453_p12 }
  0x1f   :  { %p456_p1 = pnand %p455_p0, %p449_p11 }
  0x21   :  { %459 = shalt.err (!%p456_p1)
}
  0x22   :  { %40 = dma.hbm_to_vmem [thread:$0]  %s590_s3, 2048, %s35_s8, [#allocation6], %s489_s28, %s489_s28, %s490_s29  }
  0x23   :  { %482 = dma.done.wait [#allocation3], 2048  }
  0x24   :  { %483 = vsyncadd [#allocation3], 4294965248 }
  0x25   :  { %484 = dma.done.wait [#allocation6], 2048  }
  0x26   :  { %485 = vsyncadd [#allocation6], 4294965248  ;;  %v492_v0 = vmov 0.0|0.0   ;;  %vm493_vm0 = vmmov 0   ;;  %v494_v1 = vmov 0.0   ;;  %v50_v2 = vld [vmem:[#allocation2] sm:$0xff] }
  0x27   :  { %360 = vmatprep.subr.bf16.mxu0 %v492_v0  ;;  %322 = vmatprep.mubr.msk.f32.mxu0 %vm493_vm0, %v494_v1  ;;  %v51_v3 = vld [vmem:[#allocation2 + $0x8] sm:$0xff]  ;;  %v52_v4 = vld [vmem:[#allocation2 + $0x10] sm:$0xff]  ;;  %v53_v6 = vld [vmem:[#allocation2 + $0x18] sm:$0xff] }
  0x28   :  { %384 = vmatprep.subr.bf16.mxu1 %v492_v0  ;;  %357 = vmatprep.mubr.msk.f32.mxu1 %vm493_vm0, %v494_v1  ;;  %v361_v5 = vpack.c.bf16 %v51_v3, %v50_v2  ;;  %v364_v7 = vpack.c.bf16 %v53_v6, %v52_v4  ;;  %v54_v8 = vld [vmem:[#allocation2 + $0x20] sm:$0xff]  ;;  %v55_v9 = vld [vmem:[#allocation2 + $0x28] sm:$0xff]  ;;  %v146_v12 = vld [vmem:[#allocation5 + $0x10] sm:$0xff] }
  0x29   :  { %v144_v10 = vld [vmem:[#allocation5] sm:$0xff]  ;;  %v145_v11 = vld [vmem:[#allocation5 + $0x8] sm:$0xff]  ;;  %v147_v13 = vld [vmem:[#allocation5 + $0x18] sm:$0xff]  ;;  %v367_v14 = vpack.c.bf16 %v55_v9, %v54_v8 }
  0x2a   :  { %362 = vmatpush3.bf16.msra.mxu0 %v361_v5  ;;  %v385_v15 = vpack.c.bf16 %v145_v11, %v144_v10  ;;  %v56_v16 = vld [vmem:[#allocation2 + $0x30] sm:$0xff]  ;;  %v57_v17 = vld [vmem:[#allocation2 + $0x38] sm:$0xff]  ;;  %v388_v18 = vpack.c.bf16 %v147_v13, %v146_v12  ;;  %v148_v19 = vld [vmem:[#allocation5 + $0x20] sm:$0xff] }
  0x2b   :  { %363 = vmatprep.subr.bf16.mxu0 %v492_v0  ;;  %v149_v20 = vld [vmem:[#allocation5 + $0x28] sm:$0xff]  ;;  %v370_v21 = vpack.c.bf16 %v57_v17, %v56_v16  ;;  %v58_v22 = vld [vmem:[#allocation2 + $0x40] sm:$0xff]  ;;  %v150_v25 = vld [vmem:[#allocation5 + $0x30] sm:$0xff] }
  0x2c   :  { %386 = vmatpush3.bf16.msra.mxu1 %v385_v15  ;;  %v59_v23 = vld [vmem:[#allocation2 + $0x48] sm:$0xff]  ;;  %v391_v24 = vpack.c.bf16 %v149_v20, %v148_v19  ;;  %v151_v26 = vld [vmem:[#allocation5 + $0x38] sm:$0xff]  ;;  %v60_v28 = vld [vmem:[#allocation2 + $0x50] sm:$0xff] }
  0x2d   :  { %387 = vmatprep.subr.bf16.mxu1 %v492_v0  ;;  %v373_v27 = vpack.c.bf16 %v59_v23, %v58_v22  ;;  %v61_v29 = vld [vmem:[#allocation2 + $0x58] sm:$0xff]  ;;  %v394_v30 = vpack.c.bf16 %v151_v26, %v150_v25  ;;  %v152_v31 = vld [vmem:[#allocation5 + $0x40] sm:$0xff]  ;;  %v153_v32 = vld [vmem:[#allocation5 + $0x48] sm:$0xff] }
  0x2e   :  { %365 = vmatpush3.bf16.msra.mxu0 %v364_v7  ;;  %v376_v33 = vpack.c.bf16 %v61_v29, %v60_v28  ;;  %v62_v34 = vld [vmem:[#allocation2 + $0x60] sm:$0xff]  ;;  %v63_v35 = vld [vmem:[#allocation2 + $0x68] sm:$0xff]  ;;  %v397_v36 = vpack.c.bf16 %v153_v32, %v152_v31  ;;  %v154_v37 = vld [vmem:[#allocation5 + $0x50] sm:$0xff] }
  0x2f   :  { %366 = vmatprep.subr.bf16.mxu0 %v492_v0  ;;  %v155_v38 = vld [vmem:[#allocation5 + $0x58] sm:$0xff]  ;;  %v379_v39 = vpack.c.bf16 %v63_v35, %v62_v34  ;;  %v64_v40 = vld [vmem:[#allocation2 + $0x70] sm:$0xff]  ;;  %v156_v43 = vld [vmem:[#allocation5 + $0x60] sm:$0xff] }
  0x30   :  { %389 = vmatpush3.bf16.msra.mxu1 %v388_v18  ;;  %v65_v41 = vld [vmem:[#allocation2 + $0x78] sm:$0xff]  ;;  %v400_v42 = vpack.c.bf16 %v155_v38, %v154_v37  ;;  %v157_v44 = vld [vmem:[#allocation5 + $0x68] sm:$0xff]  ;;  %v49_v47 = vld [vmem:[%s587_s0] sm:$0xff]  ;;  %s495_s0 = smov [#allocation7]  }
  0x31   :  { %390 = vmatprep.subr.bf16.mxu1 %v492_v0  ;;  %v382_v45 = vpack.c.bf16 %v65_v41, %v64_v40  ;;  %v403_v46 = vpack.c.bf16 %v157_v44, %v156_v43  ;;  %v158_v48 = vld [vmem:[#allocation5 + $0x70] sm:$0xff]  ;;  %v159_v49 = vld [vmem:[#allocation5 + $0x78] sm:$0xff]  ;;  %v254_v51 = vld [vmem:[%s589_s2] ss:$0 sm:$0xff]  ;;  %s244_s23 = sshll.u32 %s495_s0, 4  ;;  %s245_s23 = int_to_ptr.vmem [resolvable:$true] %s244_s23 }
  0x32   :  { %368 = vmatpush3.bf16.msra.mxu0 %v367_v14  ;;  %v406_v50 = vpack.c.bf16 %v159_v49, %v158_v48  ;;  %v255_v56 = vld [vmem:[%s591_s4] ss:$0 sm:$0xff]  ;;  %s460_s24 = scalar_lea.vmem %s245_s23, 128  ;;  %p465_p3 = scmp.lt.s32.totalorder %s245_s23, %s245_s23 }
  0x33   :  { %369 = vmatprep.subr.bf16.mxu0 %v492_v0  ;;  %p461_p2 = scmp.ne.s32.totalorder %s245_s23, %s460_s24  ;;  %p466_p4 = scmp.lt.s32.totalorder %s460_s24, %s460_s24 }
  0x34   :  { %392 = vmatpush3.bf16.msra.mxu1 %v391_v24 }
  0x35   :  { %393 = vmatprep.subr.bf16.mxu1 %v492_v0  ;;  %p467_p5 = por %p466_p4, %p465_p3 }
  0x36   :  { %371 = vmatpush3.bf16.msra.mxu0 %v370_v21 }
  0x37   :  { %372 = vmatprep.subr.bf16.mxu0 %v492_v0  ;;  %p468_p6 = pnand %p467_p5, %p461_p2 }
  0x38   :  { %395 = vmatpush3.bf16.msra.mxu1 %v394_v30 }
  0x39   :  { %396 = vmatprep.subr.bf16.mxu1 %v492_v0 }
  0x3a   :  { %374 = vmatpush3.bf16.msra.mxu0 %v373_v27 }
  0x3b   :  { %375 = vmatprep.subr.bf16.mxu0 %v492_v0 }
  0x3c   :  { %398 = vmatpush3.bf16.msra.mxu1 %v397_v36 }
  0x3d   :  { %399 = vmatprep.subr.bf16.mxu1 %v492_v0 }
  0x3e   :  { %377 = vmatpush3.bf16.msra.mxu0 %v376_v33 }
  0x3f   :  { %378 = vmatprep.subr.bf16.mxu0 %v492_v0 }
  0x40   :  { %401 = vmatpush3.bf16.msra.mxu1 %v400_v42 }
  0x41   :  { %402 = vmatprep.subr.bf16.mxu1 %v492_v0 }
  0x42   :  { %380 = vmatpush3.bf16.msra.mxu0 %v379_v39 }
  0x43   :  { %381 = vmatprep.subr.bf16.mxu0 %v492_v0 }
  0x44   :  { %404 = vmatpush3.bf16.msra.mxu1 %v403_v46 }
  0x45   :  { %405 = vmatprep.subr.bf16.mxu1 %v492_v0 }
  0x46   :  { %383 = vmatpush3.bf16.msra.mxu0 %v382_v45 }
  0x48   :  { %407 = vmatpush3.bf16.msra.mxu1 %v406_v50 }
  0x49   :  { %323 = vmatmul.mubr.f32.vlgmr.msra.gmra.mrb[0].mxu0 %v49_v47 }
 0x11c   :  { %v139_v52 = vpop.f32.mrb[0].mxu0 }
 0x11d   :  { %v140_v53 = vadd.f32 %v254_v51, %v139_v52  ;;  %v324_v54 = vpop.f32.mrb[1].mxu0 }
 0x11f   :  { %v143_v55 = vmax.f32 %v140_v53, 0.0 }
 0x121   :  { %358 = vmatmul.mubr.f32.vlgmr.msra.gmra.mrb[0].mxu1 %v143_v55 }
 0x1f4   :  { %v233_v57 = vpop.f32.mrb[0].mxu1 }
 0x1f5   :  { %v234_v58 = vadd.f32 %v255_v56, %v233_v57  ;;  %v359_v59 = vpop.f32.mrb[1].mxu1 }
 0x1f7   :  { %237 = vst [vmem:[#allocation7] sm:$0xff] %v234_v58 }
 0x1f8   :  { %471 = shalt.err (!%p468_p6)
}
 0x1f9   :  { %s472_s26 = scalar_lea.hbm %s592_s5, 128 }
 0x1fa   :  { %p473_p7 = scmp.ne.s32.totalorder %s592_s5, %s472_s26  ;;  %p476_p8 = scmp.lt.u32.totalorder %s472_s26, %s592_s5 }
 0x1fc   :  { %p478_p9 = pnand %p476_p8, %p473_p7 }
 0x1fe   :  { %481 = shalt.err (!%p478_p9)
}
 0x1ff   :  { %247 = dma.vmem_to_hbm [thread:$0]  %s245_s23, 128, %s592_s5, [#allocation4]  }
 0x200   :  { %486 = dma.done.wait [#allocation4], 128  }
 0x201   :  { %487 = vsyncadd [#allocation4], 4294967168 }
 0x202   :  { %251 = vsyncpa [#allocation3], 1 }
 0x203   :  { %252 = vsyncpa [#allocation6], 1 }
 0x204   :  { %253 = vsyncpa [#allocation4], 1 }

</bundles_post_ra>
